<compile_context>
chip_gen: v5e
topology: v5e:2x2
jax: 0.10.0
libtpu: 0.0.40
codegen_flags: <defaults>
</compile_context>

<pallas_src>
import functools

import jax
import jax.numpy as jnp
from jax.experimental import pallas as pl
from jax.experimental.pallas import tpu as pltpu

IN_FEATURES = 784
H1 = 256
H2 = 64
OUT_FEATURES = 10
OUT_PAD = 128         # lane-padded logits for the in-register softmax
NEG_BIG = -1e30       # bias for padded logit columns -> exp(pad - max) == 0


def mlp_softmax_kernel(x_ref, w1_ref, b1_ref, w2_ref, b2_ref, w3_ref, b3_ref, o_ref):
    bf16 = jnp.bfloat16
    x = x_ref[...].astype(bf16)                                          # (TB, 784) bf16 (VPU cast)
    h1 = jnp.dot(x, w1_ref[...],
                 preferred_element_type=jnp.float32) + b1_ref[...]       # (TB, 256) f32
    h2 = jnp.dot(h1.astype(bf16), w2_ref[...],
                 preferred_element_type=jnp.float32) + b2_ref[...]       # (TB, 64)  f32
    logits = jnp.dot(h2.astype(bf16), w3_ref[...],
                     preferred_element_type=jnp.float32) + b3_ref[...]   # (TB, 128) f32
    # Numerically stable softmax over the feature axis; padded columns carry a
    # -1e30 bias so their exp() is exactly 0 and the denominator is unaffected.
    m = jnp.max(logits, axis=-1, keepdims=True)
    e = jnp.exp(logits - m)
    denom = jnp.sum(e, axis=-1, keepdims=True)
    probs = e / denom                        # exact divide: free (HBM-bound), rows sum to 1
    o_ref[...] = probs[:, :OUT_FEATURES]     # store only the 10 real columns


def prepare_params(params):
    """One-time (hoisted out of the forward) cast/pad of the transposed PyTorch params.

    params: w* are (in_features, out_features), b* are (1, out_features), all f32.
    Returns kernel-ready tuple (w1, b1, w2, b2, w3, b3).
    """
    bf16 = jnp.bfloat16
    w1 = params["w1"].astype(bf16)                                   # (784, 256), no K pad
    b1 = params["b1"].astype(jnp.float32)                            # (1, 256)
    w2 = params["w2"].astype(bf16)                                   # (256, 64)
    b2 = params["b2"].astype(jnp.float32)                            # (1, 64)
    w3 = jnp.zeros((H2, OUT_PAD), bf16).at[:, :OUT_FEATURES].set(
        params["w3"].astype(bf16))                                   # (64, 128)
    b3 = jnp.full((1, OUT_PAD), NEG_BIG, jnp.float32).at[:, :OUT_FEATURES].set(
        params["b3"].astype(jnp.float32))                            # (1, 128)
    return w1, b1, w2, b2, w3, b3


def _round_up(n, m):
    return ((n + m - 1) // m) * m


def _pick_tb(batch, tb_max):
    """Batch tile: <= tb_max, multiple of 8, and (when the batch permits) at
    least 2 grid blocks so the parallel axis can use both v7x TensorCores."""
    tb = min(tb_max, max(8, _round_up(batch, 8)))
    if batch > 8 and pl.cdiv(batch, tb) < 2:
        tb = max(8, _round_up(pl.cdiv(batch, 2), 8))
    return tb


@functools.partial(jax.jit, static_argnames=("tb",))
def _forward(x, w1, b1, w2, b2, w3, b3, *, tb):
    B = x.shape[0]
    n_blocks = pl.cdiv(B, tb)

    def resident(shape):
        # Same block for every grid step -> DMA'd once, stays VMEM resident.
        return pl.BlockSpec(shape, lambda i: (0, 0))

    return pl.pallas_call(
        mlp_softmax_kernel,
        out_shape=jax.ShapeDtypeStruct((B, OUT_FEATURES), jnp.float32),
        grid=(n_blocks,),
        in_specs=[
            # Stream f32 x tiles over the batch; full-K block (784 == array dim).
            pl.BlockSpec((tb, IN_FEATURES), lambda i: (i, 0)),
            resident(w1.shape), resident(b1.shape),
            resident(w2.shape), resident(b2.shape),
            resident(w3.shape), resident(b3.shape),
        ],
        # Lane-narrow (10-wide) output: masked stores are fully hidden; the win
        # is 12.8x fewer HBM output bytes and no wrapper slice pass.
        out_specs=pl.BlockSpec((tb, OUT_FEATURES), lambda i: (i, 0)),
        compiler_params=pltpu.CompilerParams(
            dimension_semantics=("parallel",),  # megacore split on v7x; no-op on v5e/v6e
        ),
    )(x, w1, b1, w2, b2, w3, b3)


def mnist_model_forward(x, kernel_params, *, tb_max=512):
    """x: (B, 784) float32; kernel_params: output of prepare_params (call once)."""
    tb = _pick_tb(x.shape[0], tb_max)
    return _forward(x, *kernel_params, tb=tb)


def init_params(key):
    """Deterministic init mimicking nn.Linear default (uniform +/- 1/sqrt(fan_in)).
    Weights are stored transposed: (in_features, out_features)."""
    ks = jax.random.split(key, 6)

    def linear(kw, kb, fan_in, fan_out):
        bound = 1.0 / jnp.sqrt(fan_in)
        w = jax.random.uniform(kw, (fan_in, fan_out), jnp.float32, -bound, bound)
        b = jax.random.uniform(kb, (1, fan_out), jnp.float32, -bound, bound)
        return w, b

    w1, b1 = linear(ks[0], ks[1], IN_FEATURES, H1)
    w2, b2 = linear(ks[2], ks[3], H1, H2)
    w3, b3 = linear(ks[4], ks[5], H2, OUT_FEATURES)
    return {"w1": w1, "b1": b1, "w2": w2, "b2": b2, "w3": w3, "b3": b3}


if __name__ == "__main__":
    key = jax.random.PRNGKey(0)
    k_x, k_p = jax.random.split(key)

    batch = 8
    x = jax.random.normal(k_x, (batch, IN_FEATURES), jnp.float32)  # flattened 28x28 images
    params = init_params(k_p)
    kernel_params = prepare_params(params)   # one-time setup, hoisted out of the forward

    out = mnist_model_forward(x, kernel_params)
    out = jax.block_until_ready(out)
    assert out.shape == (batch, OUT_FEATURES)

    # Reference 1: same bf16 matmul precision as the kernel (apples-to-apples).
    bf16 = jnp.bfloat16
    h1 = jnp.dot(x.astype(bf16), params["w1"].astype(bf16),
                 preferred_element_type=jnp.float32) + params["b1"]
    h2 = jnp.dot(h1.astype(bf16), params["w2"].astype(bf16),
                 preferred_element_type=jnp.float32) + params["b2"]
    lg = jnp.dot(h2.astype(bf16), params["w3"].astype(bf16),
                 preferred_element_type=jnp.float32) + params["b3"]
    ref_bf16 = jax.nn.softmax(lg, axis=1)
    assert jnp.allclose(out, ref_bf16, atol=2e-2), float(jnp.max(jnp.abs(out - ref_bf16)))

    # Reference 2: full-f32 PyTorch-equivalent forward (looser: kernel uses bf16 matmuls).
    h = x @ params["w1"] + params["b1"]
    h = h @ params["w2"] + params["b2"]
    logits = h @ params["w3"] + params["b3"]
    ref_f32 = jax.nn.softmax(logits, axis=1)
    assert jnp.allclose(out, ref_f32, atol=5e-2), float(jnp.max(jnp.abs(out - ref_f32)))

    # Rows sum to ~1 (exact divide in the kernel -> tight tolerance).
    assert jnp.allclose(jnp.sum(out, axis=1), 1.0, atol=1e-3)

    print("KERNEL_OK")
</pallas_src>

<mosaic_0001>
module attributes {stable_mosaic.version = 11 : i64} {
  func.func @mlp_softmax_kernel(%arg0: i32, %arg1: memref<8x784xf32, #tpu.memory_space<vmem>>, %arg2: memref<784x256xbf16, #tpu.memory_space<vmem>>, %arg3: memref<1x256xf32, #tpu.memory_space<vmem>>, %arg4: memref<256x64xbf16, #tpu.memory_space<vmem>>, %arg5: memref<1x64xf32, #tpu.memory_space<vmem>>, %arg6: memref<64x128xbf16, #tpu.memory_space<vmem>>, %arg7: memref<1x128xf32, #tpu.memory_space<vmem>>, %arg8: memref<8x10xf32, #tpu.memory_space<vmem>>) attributes {dimension_semantics = [#tpu.dimension_semantics<parallel>], iteration_bounds = array<i64: 1>, scalar_prefetch = 0 : i64, scratch_operands = 0 : i64, tpu.core_type = #tpu.core_type<tc>, window_params = [{transform_indices = @transform_0, window_bounds = array<i64: 8, 784>}, {pipeline_mode = #tpu.pipeline_mode<synchronous>, transform_indices = @transform_1, window_bounds = array<i64: 784, 256>}, {pipeline_mode = #tpu.pipeline_mode<synchronous>, transform_indices = @transform_2, window_bounds = array<i64: 1, 256>}, {pipeline_mode = #tpu.pipeline_mode<synchronous>, transform_indices = @transform_3, window_bounds = array<i64: 256, 64>}, {pipeline_mode = #tpu.pipeline_mode<synchronous>, transform_indices = @transform_4, window_bounds = array<i64: 1, 64>}, {pipeline_mode = #tpu.pipeline_mode<synchronous>, transform_indices = @transform_5, window_bounds = array<i64: 64, 128>}, {pipeline_mode = #tpu.pipeline_mode<synchronous>, transform_indices = @transform_6, window_bounds = array<i64: 1, 128>}, {transform_indices = @transform_7, window_bounds = array<i64: 8, 10>}]} {
    %c0 = arith.constant 0 : index
    %c0_0 = arith.constant 0 : index
    %0 = vector.load %arg1[%c0, %c0_0] : memref<8x784xf32, #tpu.memory_space<vmem>>, vector<8x784xf32>
    %1 = arith.truncf %0 : vector<8x784xf32> to vector<8x784xbf16>
    %c0_1 = arith.constant 0 : index
    %c0_2 = arith.constant 0 : index
    %2 = vector.load %arg2[%c0_1, %c0_2] : memref<784x256xbf16, #tpu.memory_space<vmem>>, vector<784x256xbf16>
    %cst = arith.constant dense<0.000000e+00> : vector<8x256xf32>
    %3 = tpu.matmul %1, %2, %cst {dimension_numbers = #tpu.dot_dimension_numbers<[1], [0], [0], [1], [0, 0, 1, 1], [], []>} : vector<8x784xbf16>, vector<784x256xbf16>, vector<8x256xf32> -> vector<8x256xf32>
    %c0_3 = arith.constant 0 : index
    %c0_4 = arith.constant 0 : index
    %4 = vector.load %arg3[%c0_3, %c0_4] : memref<1x256xf32, #tpu.memory_space<vmem>>, vector<1x256xf32>
    %5 = vector.broadcast %4 : vector<1x256xf32> to vector<8x256xf32>
    %6 = arith.addf %3, %5 : vector<8x256xf32>
    %7 = arith.truncf %6 : vector<8x256xf32> to vector<8x256xbf16>
    %c0_5 = arith.constant 0 : index
    %c0_6 = arith.constant 0 : index
    %8 = vector.load %arg4[%c0_5, %c0_6] : memref<256x64xbf16, #tpu.memory_space<vmem>>, vector<256x64xbf16>
    %cst_7 = arith.constant dense<0.000000e+00> : vector<8x64xf32>
    %9 = tpu.matmul %7, %8, %cst_7 {dimension_numbers = #tpu.dot_dimension_numbers<[1], [0], [0], [1], [0, 0, 1, 1], [], []>} : vector<8x256xbf16>, vector<256x64xbf16>, vector<8x64xf32> -> vector<8x64xf32>
    %c0_8 = arith.constant 0 : index
    %c0_9 = arith.constant 0 : index
    %10 = vector.load %arg5[%c0_8, %c0_9] : memref<1x64xf32, #tpu.memory_space<vmem>>, vector<1x64xf32>
    %11 = vector.broadcast %10 : vector<1x64xf32> to vector<8x64xf32>
    %12 = arith.addf %9, %11 : vector<8x64xf32>
    %13 = arith.truncf %12 : vector<8x64xf32> to vector<8x64xbf16>
    %c0_10 = arith.constant 0 : index
    %c0_11 = arith.constant 0 : index
    %14 = vector.load %arg6[%c0_10, %c0_11] : memref<64x128xbf16, #tpu.memory_space<vmem>>, vector<64x128xbf16>
    %cst_12 = arith.constant dense<0.000000e+00> : vector<8x128xf32>
    %15 = tpu.matmul %13, %14, %cst_12 {dimension_numbers = #tpu.dot_dimension_numbers<[1], [0], [0], [1], [0, 0, 1, 1], [], []>} : vector<8x64xbf16>, vector<64x128xbf16>, vector<8x128xf32> -> vector<8x128xf32>
    %c0_13 = arith.constant 0 : index
    %c0_14 = arith.constant 0 : index
    %16 = vector.load %arg7[%c0_13, %c0_14] : memref<1x128xf32, #tpu.memory_space<vmem>>, vector<1x128xf32>
    %17 = vector.broadcast %16 : vector<1x128xf32> to vector<8x128xf32>
    %18 = arith.addf %15, %17 : vector<8x128xf32>
    %cst_15 = arith.constant dense<0xFF800000> : vector<8xf32>
    %19 = vector.multi_reduction <maximumf>, %18, %cst_15 [1] : vector<8x128xf32> to vector<8xf32>
    %20 = vector.shape_cast %19 : vector<8xf32> to vector<8x1xf32>
    %21 = vector.broadcast %20 : vector<8x1xf32> to vector<8x128xf32>
    %22 = arith.subf %18, %21 : vector<8x128xf32>
    %23 = math.exp %22 : vector<8x128xf32>
    %cst_16 = arith.constant dense<0.000000e+00> : vector<8xf32>
    %24 = vector.multi_reduction <add>, %23, %cst_16 [1] : vector<8x128xf32> to vector<8xf32>
    %25 = vector.shape_cast %24 : vector<8xf32> to vector<8x1xf32>
    %26 = vector.broadcast %25 : vector<8x1xf32> to vector<8x128xf32>
    %27 = arith.divf %23, %26 : vector<8x128xf32>
    %28 = vector.extract_strided_slice %27 {offsets = [0, 0], sizes = [8, 10], strides = [1, 1]} : vector<8x128xf32> to vector<8x10xf32>
    %c0_17 = arith.constant 0 : index
    %c0_18 = arith.constant 0 : index
    %29 = vector.load %arg8[%c0_17, %c0_18] : memref<8x10xf32, #tpu.memory_space<vmem>>, vector<8x10xf32>
    tpu.vector_store %arg8[%c0_17, %c0_18], %28 {strides = array<i32>} : memref<8x10xf32, #tpu.memory_space<vmem>>, vector<8x10xf32>,
    return
  }
  func.func @transform_0(%arg0: i32) -> (i32, i32) {
    %c0_i32 = arith.constant 0 : i32
    %c0_i32_0 = arith.constant 0 : i32
    return %arg0, %c0_i32 : i32, i32
  }
  func.func @transform_1(%arg0: i32) -> (i32, i32) {
    %c0_i32 = arith.constant 0 : i32
    %c0_i32_0 = arith.constant 0 : i32
    %c0_i32_1 = arith.constant 0 : i32
    return %c0_i32, %c0_i32_0 : i32, i32
  }
  func.func @transform_2(%arg0: i32) -> (i32, i32) {
    %c0_i32 = arith.constant 0 : i32
    %c0_i32_0 = arith.constant 0 : i32
    %c0_i32_1 = arith.constant 0 : i32
    return %c0_i32, %c0_i32_0 : i32, i32
  }
  func.func @transform_3(%arg0: i32) -> (i32, i32) {
    %c0_i32 = arith.constant 0 : i32
    %c0_i32_0 = arith.constant 0 : i32
    %c0_i32_1 = arith.constant 0 : i32
    return %c0_i32, %c0_i32_0 : i32, i32
  }
  func.func @transform_4(%arg0: i32) -> (i32, i32) {
    %c0_i32 = arith.constant 0 : i32
    %c0_i32_0 = arith.constant 0 : i32
    %c0_i32_1 = arith.constant 0 : i32
    return %c0_i32, %c0_i32_0 : i32, i32
  }
  func.func @transform_5(%arg0: i32) -> (i32, i32) {
    %c0_i32 = arith.constant 0 : i32
    %c0_i32_0 = arith.constant 0 : i32
    %c0_i32_1 = arith.constant 0 : i32
    return %c0_i32, %c0_i32_0 : i32, i32
  }
  func.func @transform_6(%arg0: i32) -> (i32, i32) {
    %c0_i32 = arith.constant 0 : i32
    %c0_i32_0 = arith.constant 0 : i32
    %c0_i32_1 = arith.constant 0 : i32
    return %c0_i32, %c0_i32_0 : i32, i32
  }
  func.func @transform_7(%arg0: i32) -> (i32, i32) {
    %c0_i32 = arith.constant 0 : i32
    %c0_i32_0 = arith.constant 0 : i32
    return %arg0, %c0_i32 : i32, i32
  }
}

</mosaic_0001>

<bundles_post_ra>
// kernel: _forward.1
= control target key start
LH: loop header
LB: loop body
LE: loop exit
PB: predicated region body
PF: predicated region fallthrough
CT: control target
= control target key end

     0   :  { %12 = vsyncpa [#allocation3], 0  ;;  %s1918_s0 = inlined_call_operand.vmem [shape: f32[8,784], index: 0, kind: input, shape index: {}]   ;;  %s1919_s1 = inlined_call_operand.hbm [shape: bf16[784,256], index: 1, kind: input, shape index: {}]   ;;  %s1920_s2 = inlined_call_operand.vmem [shape: f32[1,256], index: 2, kind: input, shape index: {}]   ;;  %s1921_s3 = inlined_call_operand.vmem [shape: bf16[256,64], index: 3, kind: input, shape index: {}]   ;;  %s1922_s4 = inlined_call_operand.vmem [shape: f32[1,64], index: 4, kind: input, shape index: {}]   ;;  %s1923_s5 = inlined_call_operand.vmem [shape: bf16[64,128], index: 5, kind: input, shape index: {}]   ;;  %s1924_s6 = inlined_call_operand.vmem [shape: f32[1,128], index: 6, kind: input, shape index: {}]   ;;  %s1925_s7 = inlined_call_operand.hbm [shape: f32[8,10], index: 7, kind: output, shape index: {}]  }
   0x1   :  { %13 = vsyncpa [#allocation4], 0  ;;  %s20_s26 = sshll.u32 %s1919_s1, 4  ;;  %s1748_s27 = smov [#allocation2]   ;;  %s21_s26 = int_to_ptr.hbm [resolvable:$true] %s20_s26 }
   0x2   :  { %s22_s28 = sshll.u32 %s1748_s27, 4  ;;  %s1749_s29 = smov 128   ;;  %s23_s28 = int_to_ptr.vmem [resolvable:$true] %s22_s28 }
   0x3   :  { %s1750_s30 = smov 8  }
   0x4   :  { %28 = dma.hbm_to_vmem [thread:$0]  %s21_s26, 12544, %s23_s28, [#allocation3], %s1749_s29, %s1749_s29, %s1750_s30  }
   0x5   :  { %1744 = dma.done.wait [#allocation3], 12544  }
   0x6   :  { %1745 = vsyncadd [#allocation3], 4294954752  ;;  %v1151_v0 = vld [vmem:[#allocation2 + $0x70] sm:$0xf]  ;;  %v1583_v1 = vld [vmem:[#allocation2 + $0x74] sm:$0xf0] }
   0x7   :  { %v1279_v2 = vld [vmem:[#allocation2 + $0x170] sm:$0xf]  ;;  %v1152_v3 = vor.u32 %v1583_v1, %v1151_v0  ;;  %v1615_v4 = vld [vmem:[#allocation2 + $0x174] sm:$0xf0]  ;;  %v1143_v11 = vld [vmem:[#allocation2 + $0x60] sm:$0xf] }
   0x8   :  { %v1343_v5 = vld [vmem:[#allocation2 + $0x1f0] sm:$0xf]  ;;  %v1631_v6 = vld [vmem:[#allocation2 + $0x1f4] sm:$0xf0]  ;;  %v1280_v7 = vor.u32 %v1615_v4, %v1279_v2  ;;  %v1581_v13 = vld [vmem:[#allocation2 + $0x64] sm:$0xf0] }
   0x9   :  { %v1344_v8 = vor.u32 %v1631_v6, %v1343_v5  ;;  %v1215_v9 = vld [vmem:[#allocation2 + $0xf0] sm:$0xf]  ;;  %v1599_v10 = vld [vmem:[#allocation2 + $0xf4] sm:$0xf0]  ;;  %656 = vmatpush.bf16.msra.mxu0 %v1152_v3  ;;  %v1271_v14 = vld [vmem:[#allocation2 + $0x160] sm:$0xf]  ;;  %v1144_v16 = vor.u32 %v1581_v13, %v1143_v11 }
   0xa   :  { %v1216_v12 = vor.u32 %v1599_v10, %v1215_v9  ;;  %v1613_v15 = vld [vmem:[#allocation2 + $0x164] sm:$0xf0]  ;;  %682 = vmatpush.bf16.msra.mxu2 %v1280_v7  ;;  %v1335_v18 = vld [vmem:[#allocation2 + $0x1e0] sm:$0xf]  ;;  %v1135_v23 = vld [vmem:[#allocation2 + $0x50] sm:$0xf] }
   0xb   :  { %695 = vmatpush.bf16.msra.mxu3 %v1344_v8  ;;  %v1272_v17 = vor.u32 %v1613_v15, %v1271_v14  ;;  %v1629_v19 = vld [vmem:[#allocation2 + $0x1e4] sm:$0xf0]  ;;  %v1207_v20 = vld [vmem:[#allocation2 + $0xe0] sm:$0xf]  ;;  %v1579_v24 = vld [vmem:[#allocation2 + $0x54] sm:$0xf0] }
   0xc   :  { %669 = vmatpush.bf16.msra.mxu1 %v1216_v12  ;;  %v1336_v21 = vor.u32 %v1629_v19, %v1335_v18  ;;  %v1597_v22 = vld [vmem:[#allocation2 + $0xe4] sm:$0xf0]  ;;  %v1263_v26 = vld [vmem:[#allocation2 + $0x150] sm:$0xf]  ;;  %v1611_v27 = vld [vmem:[#allocation2 + $0x154] sm:$0xf0]  ;;  %v1136_v29 = vor.u32 %v1579_v24, %v1135_v23 }
   0xd   :  { %v1208_v25 = vor.u32 %v1597_v22, %v1207_v20  ;;  %v1327_v28 = vld [vmem:[#allocation2 + $0x1d0] sm:$0xf]  ;;  %657 = vmatpush.bf16.msra.mxu0 %v1144_v16  ;;  %v1627_v30 = vld [vmem:[#allocation2 + $0x1d4] sm:$0xf0]  ;;  %v1264_v33 = vor.u32 %v1611_v27, %v1263_v26  ;;  %v1127_v35 = vld [vmem:[#allocation2 + $0x40] sm:$0xf] }
   0xe   :  { %v1199_v31 = vld [vmem:[#allocation2 + $0xd0] sm:$0xf]  ;;  %v1595_v32 = vld [vmem:[#allocation2 + $0xd4] sm:$0xf0]  ;;  %683 = vmatpush.bf16.msra.mxu2 %v1272_v17  ;;  %v1328_v34 = vor.u32 %v1627_v30, %v1327_v28  ;;  %v1577_v36 = vld [vmem:[#allocation2 + $0x44] sm:$0xf0] }
   0xf   :  { %696 = vmatpush.bf16.msra.mxu3 %v1336_v21  ;;  %v1255_v37 = vld [vmem:[#allocation2 + $0x140] sm:$0xf]  ;;  %v1200_v38 = vor.u32 %v1595_v32, %v1199_v31  ;;  %v1609_v39 = vld [vmem:[#allocation2 + $0x144] sm:$0xf0]  ;;  %v1128_v44 = vor.u32 %v1577_v36, %v1127_v35  ;;  %v1119_v47 = vld [vmem:[#allocation2 + $0x30] sm:$0xf] }
  0x10   :  { %670 = vmatpush.bf16.msra.mxu1 %v1208_v25  ;;  %v1319_v40 = vld [vmem:[#allocation2 + $0x1c0] sm:$0xf]  ;;  %v1625_v41 = vld [vmem:[#allocation2 + $0x1c4] sm:$0xf0]  ;;  %v1256_v45 = vor.u32 %v1609_v39, %v1255_v37  ;;  %v1575_v48 = vld [vmem:[#allocation2 + $0x34] sm:$0xf0] }
  0x11   :  { %v1191_v42 = vld [vmem:[#allocation2 + $0xc0] sm:$0xf]  ;;  %v1593_v43 = vld [vmem:[#allocation2 + $0xc4] sm:$0xf0]  ;;  %658 = vmatpush.bf16.msra.mxu0 %v1136_v29  ;;  %v1320_v46 = vor.u32 %v1625_v41, %v1319_v40  ;;  %v1247_v49 = vld [vmem:[#allocation2 + $0x130] sm:$0xf]  ;;  %v1120_v56 = vor.u32 %v1575_v48, %v1119_v47 }
  0x12   :  { %684 = vmatpush.bf16.msra.mxu2 %v1264_v33  ;;  %v1192_v50 = vor.u32 %v1593_v43, %v1191_v42  ;;  %v1607_v51 = vld [vmem:[#allocation2 + $0x134] sm:$0xf0]  ;;  %v1311_v52 = vld [vmem:[#allocation2 + $0x1b0] sm:$0xf]  ;;  %v1111_v59 = vld [vmem:[#allocation2 + $0x20] sm:$0xf] }
  0x13   :  { %697 = vmatpush.bf16.msra.mxu3 %v1328_v34  ;;  %v1623_v53 = vld [vmem:[#allocation2 + $0x1b4] sm:$0xf0]  ;;  %v1183_v54 = vld [vmem:[#allocation2 + $0xb0] sm:$0xf]  ;;  %v1248_v57 = vor.u32 %v1607_v51, %v1247_v49  ;;  %v1573_v60 = vld [vmem:[#allocation2 + $0x24] sm:$0xf0] }
  0x14   :  { %671 = vmatpush.bf16.msra.mxu1 %v1200_v38  ;;  %v1591_v55 = vld [vmem:[#allocation2 + $0xb4] sm:$0xf0]  ;;  %v1312_v58 = vor.u32 %v1623_v53, %v1311_v52  ;;  %v1239_v61 = vld [vmem:[#allocation2 + $0x120] sm:$0xf]  ;;  %v1605_v63 = vld [vmem:[#allocation2 + $0x124] sm:$0xf0]  ;;  %v1112_v4 = vor.u32 %v1573_v60, %v1111_v59 }
  0x15   :  { %659 = vmatpush.bf16.msra.mxu0 %v1128_v44  ;;  %v1184_v62 = vor.u32 %v1591_v55, %v1183_v54  ;;  %v1303_v0 = vld [vmem:[#allocation2 + $0x1a0] sm:$0xf]  ;;  %v1621_v1 = vld [vmem:[#allocation2 + $0x1a4] sm:$0xf0]  ;;  %v1240_v5 = vor.u32 %v1605_v63, %v1239_v61  ;;  %v1103_v7 = vld [vmem:[#allocation2 + $0x10] sm:$0xf] }
  0x16   :  { %685 = vmatpush.bf16.msra.mxu2 %v1256_v45  ;;  %v1175_v2 = vld [vmem:[#allocation2 + $0xa0] sm:$0xf]  ;;  %v1589_v3 = vld [vmem:[#allocation2 + $0xa4] sm:$0xf0]  ;;  %v1304_v6 = vor.u32 %v1621_v1, %v1303_v0  ;;  %v1571_v8 = vld [vmem:[#allocation2 + $0x14] sm:$0xf0] }
  0x17   :  { %698 = vmatpush.bf16.msra.mxu3 %v1320_v46  ;;  %v1231_v9 = vld [vmem:[#allocation2 + $0x110] sm:$0xf]  ;;  %v1176_v10 = vor.u32 %v1589_v3, %v1175_v2  ;;  %v1603_v11 = vld [vmem:[#allocation2 + $0x114] sm:$0xf0]  ;;  %v1104_v16 = vor.u32 %v1571_v8, %v1103_v7  ;;  %v1095_v17 = vld [vmem:[#allocation2] sm:$0xf] }
  0x18   :  { %672 = vmatpush.bf16.msra.mxu1 %v1192_v50  ;;  %v1295_v12 = vld [vmem:[#allocation2 + $0x190] sm:$0xf]  ;;  %v1619_v13 = vld [vmem:[#allocation2 + $0x194] sm:$0xf0]  ;;  %v1569_v18 = vld [vmem:[#allocation2 + $0x4] sm:$0xf0]  ;;  %v1232_v20 = vor.u32 %v1603_v11, %v1231_v9 }
  0x19   :  { %660 = vmatpush.bf16.msra.mxu0 %v1120_v56  ;;  %v1167_v14 = vld [vmem:[#allocation2 + $0x90] sm:$0xf]  ;;  %v1587_v15 = vld [vmem:[#allocation2 + $0x94] sm:$0xf0]  ;;  %v1223_v19 = vld [vmem:[#allocation2 + $0x100] sm:$0xf]  ;;  %v1296_v21 = vor.u32 %v1619_v13, %v1295_v12  ;;  %v1096_v32 = vor.u32 %v1569_v18, %v1095_v17 }
  0x1a   :  { %686 = vmatpush.bf16.msra.mxu2 %v1248_v57  ;;  %v1601_v22 = vld [vmem:[#allocation2 + $0x104] sm:$0xf0]  ;;  %v1287_v23 = vld [vmem:[#allocation2 + $0x180] sm:$0xf]  ;;  %v1168_v25 = vor.u32 %v1587_v15, %v1167_v14  ;;  %v1407_v26 = vld [vmem:[#allocation2 + $0x270] sm:$0xf] }
  0x1b   :  { %699 = vmatpush.bf16.msra.mxu3 %v1312_v58  ;;  %v1617_v24 = vld [vmem:[#allocation2 + $0x184] sm:$0xf0]  ;;  %v1647_v27 = vld [vmem:[#allocation2 + $0x274] sm:$0xf0]  ;;  %v1582_v28 = vld [vmem:[#allocation2 + $0x74] sm:$0xf]  ;;  %v1224_v36 = vor.u32 %v1601_v22, %v1223_v19 }
  0x1c   :  { %673 = vmatpush.bf16.msra.mxu1 %v1184_v62  ;;  %v1153_v29 = vld [vmem:[#allocation2 + $0x78] sm:$0xf0]  ;;  %v1159_v30 = vld [vmem:[#allocation2 + $0x80] sm:$0xf]  ;;  %v1585_v31 = vld [vmem:[#allocation2 + $0x84] sm:$0xf0]  ;;  %v1288_v37 = vor.u32 %v1617_v24, %v1287_v23  ;;  %v1408_v41 = vor.u32 %v1647_v27, %v1407_v26 }
  0x1d   :  { %661 = vmatpush.bf16.msra.mxu0 %v1112_v4  ;;  %v46_v33 = vld [vmem:[%s1918_s0 + $0x10] sm:$0xff]  ;;  %v1479_v34 = vld [vmem:[#allocation2 + $0x300] sm:$0xf]  ;;  %v1665_v35 = vld [vmem:[#allocation2 + $0x304] sm:$0xf0]  ;;  %v1156_v42 = vor.u32 %v1582_v28, %v1153_v29  ;;  %v1160_v46 = vor.u32 %v1585_v31, %v1159_v30  ;;  %vm652_vm0 = vcmask 130048  }
  0x1e   :  { %687 = vmatpush.bf16.msra.mxu2 %v1240_v5  ;;  %v1471_v38 = vld [vmem:[#allocation2 + $0x2f0] sm:$0xf]  ;;  %v1663_v39 = vld [vmem:[#allocation2 + $0x2f4] sm:$0xf0]  ;;  %v1598_v40 = vld [vmem:[#allocation2 + $0xf4] sm:$0xf]  ;;  %v1480_v47 = vor.u32 %v1665_v35, %v1479_v34  ;;  %v1801_v51 = vpack.c.bf16 %v46_v33, %v46_v33 }
  0x1f   :  { %700 = vmatpush.bf16.msra.mxu3 %v1304_v6  ;;  %v1217_v43 = vld [vmem:[#allocation2 + $0xf8] sm:$0xf0]  ;;  %v1399_v44 = vld [vmem:[#allocation2 + $0x260] sm:$0xf]  ;;  %v1645_v48 = vld [vmem:[#allocation2 + $0x264] sm:$0xf0]  ;;  %v1472_v52 = vor.u32 %v1663_v39, %v1471_v38 }
  0x20   :  { %674 = vmatpush.bf16.msra.mxu1 %v1176_v10  ;;  %v44_v45 = vld [vmem:[%s1918_s0] sm:$0xff]  ;;  %v1145_v50 = vld [vmem:[#allocation2 + $0x68] sm:$0xf0]  ;;  %v47_v53 = vld [vmem:[%s1918_s0 + $0x18] sm:$0xff]  ;;  %v1220_v55 = vor.u32 %v1598_v40, %v1217_v43  ;;  %v1400_v59 = vor.u32 %v1645_v48, %v1399_v44  ;;  %vm1035_vm1 = vcmask 523264   ;;  %s1083_s16 = sshll.u32 %s1925_s7, 4  ;;  %s1084_s16 = int_to_ptr.hbm [resolvable:$true] %s1083_s16 }
  0x21   :  { %662 = vmatpush.bf16.msra.mxu0 %v1104_v16  ;;  %v1580_v49 = vld [vmem:[#allocation2 + $0x64] sm:$0xf]  ;;  %v45_v54 = vld [vmem:[%s1918_s0 + $0x8] sm:$0xff]  ;;  %v1463_v56 = vld [vmem:[#allocation2 + $0x2e0] sm:$0xf]  ;;  %v1809_v58 = vpack.c.bf16 %v44_v45, %v44_v45  ;;  %v1811_v3 = vpack.c.bf16 %v47_v53, %v47_v53  ;;  %vm1074_vm6 = vcmask 80896  }
  0x22   :  { %688 = vmatpush.bf16.msra.mxu2 %v1232_v20  ;;  %v1661_v57 = vld [vmem:[#allocation2 + $0x2e4] sm:$0xf0]  ;;  %v1148_v60 = vor.u32 %v1580_v49, %v1145_v50  ;;  %v1596_v61 = vld [vmem:[#allocation2 + $0xe4] sm:$0xf]  ;;  %v1209_v62 = vld [vmem:[#allocation2 + $0xe8] sm:$0xf0]  ;;  %v1813_v4 = vpack.c.bf16 %v45_v54, %v45_v54 }
  0x23   :  { %701 = vmatpush.bf16.msra.mxu3 %v1296_v21  ;;  %v1391_v63 = vld [vmem:[#allocation2 + $0x250] sm:$0xf]  ;;  %v1643_v0 = vld [vmem:[#allocation2 + $0x254] sm:$0xf0]  ;;  %v1578_v1 = vld [vmem:[#allocation2 + $0x54] sm:$0xf]  ;;  %v1464_v5 = vor.u32 %v1661_v57, %v1463_v56  ;;  %v1212_v6 = vor.u32 %v1596_v61, %v1209_v62 }
  0x24   :  { %675 = vmatpush.bf16.msra.mxu1 %v1168_v25  ;;  %v1137_v2 = vld [vmem:[#allocation2 + $0x58] sm:$0xf0]  ;;  %v1455_v7 = vld [vmem:[#allocation2 + $0x2d0] sm:$0xf]  ;;  %v1659_v8 = vld [vmem:[#allocation2 + $0x2d4] sm:$0xf0]  ;;  %v1392_v9 = vor.u32 %v1643_v0, %v1391_v63 }
  0x25   :  { %663 = vmatpush.bf16.msra.mxu0 %v1096_v32  ;;  %v1140_v10 = vor.u32 %v1578_v1, %v1137_v2  ;;  %v1594_v11 = vld [vmem:[#allocation2 + $0xd4] sm:$0xf]  ;;  %v1201_v12 = vld [vmem:[#allocation2 + $0xd8] sm:$0xf0]  ;;  %v1383_v13 = vld [vmem:[#allocation2 + $0x240] sm:$0xf]  ;;  %v1456_v17 = vor.u32 %v1659_v8, %v1455_v7 }
  0x26   :  { %689 = vmatpush.bf16.msra.mxu2 %v1224_v36  ;;  %v1641_v14 = vld [vmem:[#allocation2 + $0x244] sm:$0xf0]  ;;  %v1576_v15 = vld [vmem:[#allocation2 + $0x44] sm:$0xf]  ;;  %v1129_v16 = vld [vmem:[#allocation2 + $0x48] sm:$0xf0]  ;;  %v1204_v18 = vor.u32 %v1594_v11, %v1201_v12 }
  0x27   :  { %702 = vmatpush.bf16.msra.mxu3 %v1288_v37  ;;  %v1447_v19 = vld [vmem:[#allocation2 + $0x2c0] sm:$0xf]  ;;  %v1657_v20 = vld [vmem:[#allocation2 + $0x2c4] sm:$0xf0]  ;;  %v1384_v21 = vor.u32 %v1641_v14, %v1383_v13  ;;  %v1132_v22 = vor.u32 %v1576_v15, %v1129_v16  ;;  %v1592_v23 = vld [vmem:[#allocation2 + $0xc4] sm:$0xf] }
  0x28   :  { %676 = vmatpush.bf16.msra.mxu1 %v1160_v46  ;;  %664 = vmatmul.bf16.vlgmr.msra.gmra.mxu0 %v1809_v58  ;;  %v1193_v24 = vld [vmem:[#allocation2 + $0xc8] sm:$0xf0]  ;;  %v1375_v25 = vld [vmem:[#allocation2 + $0x230] sm:$0xf]  ;;  %v1639_v26 = vld [vmem:[#allocation2 + $0x234] sm:$0xf0]  ;;  %v1448_v29 = vor.u32 %v1657_v20, %v1447_v19 }
  0x29   :  { %708 = vmatpush.bf16.msrb.mxu0 %v1408_v41  ;;  %690 = vmatmul.bf16.vlgmr.msra.gmra.mxu2 %v1801_v51  ;;  %v1574_v27 = vld [vmem:[#allocation2 + $0x34] sm:$0xf]  ;;  %v1121_v28 = vld [vmem:[#allocation2 + $0x38] sm:$0xf0]  ;;  %v1196_v30 = vor.u32 %v1592_v23, %v1193_v24  ;;  %v1439_v31 = vld [vmem:[#allocation2 + $0x2b0] sm:$0xf]  ;;  %v1376_v34 = vor.u32 %v1639_v26, %v1375_v25 }
  0x2a   :  { %741 = vmatpush.bf16.msrb.mxu2 %v1480_v47  ;;  %703 = vmatmul.bf16.vlgmr.msra.gmra.mxu3 %v1811_v3  ;;  %v1655_v32 = vld [vmem:[#allocation2 + $0x2b4] sm:$0xf0]  ;;  %v50_v33 = vld [vmem:[%s1918_s0 + $0x30] sm:$0xff]  ;;  %v1124_v35 = vor.u32 %v1574_v27, %v1121_v28  ;;  %v1185_v37 = vld [vmem:[#allocation2 + $0xb8] sm:$0xf0] }
  0x2b   :  { %747 = vmatpush.bf16.msrb.mxu3 %v1156_v42  ;;  %677 = vmatmul.bf16.vlgmr.msra.gmra.mxu1 %v1813_v4  ;;  %v1590_v36 = vld [vmem:[#allocation2 + $0xb4] sm:$0xf]  ;;  %v1367_v38 = vld [vmem:[#allocation2 + $0x220] sm:$0xf]  ;;  %v1637_v39 = vld [vmem:[#allocation2 + $0x224] sm:$0xf0]  ;;  %v1440_v42 = vor.u32 %v1655_v32, %v1439_v31  ;;  %v1822_v43 = vpack.c.bf16 %v50_v33, %v50_v33 }
  0x2c   :  { %721 = vmatpush.bf16.msrb.mxu1 %v1472_v52  ;;  %v1572_v40 = vld [vmem:[#allocation2 + $0x24] sm:$0xf]  ;;  %v1113_v41 = vld [vmem:[#allocation2 + $0x28] sm:$0xf0]  ;;  %v1188_v44 = vor.u32 %v1590_v36, %v1185_v37  ;;  %v1431_v45 = vld [vmem:[#allocation2 + $0x2a0] sm:$0xf]  ;;  %v1368_v47 = vor.u32 %v1637_v39, %v1367_v38 }
  0x2d   :  { %709 = vmatpush.bf16.msrb.mxu0 %v1400_v59  ;;  %v1653_v46 = vld [vmem:[#allocation2 + $0x2a4] sm:$0xf0]  ;;  %v1116_v48 = vor.u32 %v1572_v40, %v1113_v41  ;;  %v1588_v49 = vld [vmem:[#allocation2 + $0xa4] sm:$0xf]  ;;  %v1177_v50 = vld [vmem:[#allocation2 + $0xa8] sm:$0xf0] }
  0x2e   :  { %760 = vmatpush.bf16.msra.mxu2 %v1220_v55  ;;  %v1359_v52 = vld [vmem:[#allocation2 + $0x210] sm:$0xf]  ;;  %v1635_v53 = vld [vmem:[#allocation2 + $0x214] sm:$0xf0]  ;;  %v1570_v54 = vld [vmem:[#allocation2 + $0x14] sm:$0xf]  ;;  %v1432_v56 = vor.u32 %v1653_v46, %v1431_v45  ;;  %v1180_v57 = vor.u32 %v1588_v49, %v1177_v50 }
  0x2f   :  { %748 = vmatpush.bf16.msrb.mxu3 %v1148_v60  ;;  %v1105_v55 = vld [vmem:[#allocation2 + $0x18] sm:$0xf0]  ;;  %v1423_v59 = vld [vmem:[#allocation2 + $0x290] sm:$0xf]  ;;  %v1651_v60 = vld [vmem:[#allocation2 + $0x294] sm:$0xf0]  ;;  %v1360_v62 = vor.u32 %v1635_v53, %v1359_v52 }
  0x30   :  { %722 = vmatpush.bf16.msrb.mxu1 %v1464_v5  ;;  %v1586_v61 = vld [vmem:[#allocation2 + $0x94] sm:$0xf]  ;;  %v1108_v63 = vor.u32 %v1570_v54, %v1105_v55  ;;  %v1169_v0 = vld [vmem:[#allocation2 + $0x98] sm:$0xf0]  ;;  %v1351_v1 = vld [vmem:[#allocation2 + $0x200] sm:$0xf]  ;;  %v1424_v8 = vor.u32 %v1651_v60, %v1423_v59 }
  0x31   :  { %710 = vmatpush.bf16.msrb.mxu0 %v1392_v9  ;;  %v1633_v2 = vld [vmem:[#allocation2 + $0x204] sm:$0xf0]  ;;  %v1568_v5 = vld [vmem:[#allocation2 + $0x4] sm:$0xf]  ;;  %v1614_v7 = vld [vmem:[#allocation2 + $0x174] sm:$0xf]  ;;  %v1172_v12 = vor.u32 %v1586_v61, %v1169_v0 }
  0x32   :  { %761 = vmatpush.bf16.msra.mxu2 %v1212_v6  ;;  %v1097_v6 = vld [vmem:[#allocation2 + $0x8] sm:$0xf0]  ;;  %v1281_v9 = vld [vmem:[#allocation2 + $0x178] sm:$0xf0]  ;;  %v1415_v13 = vld [vmem:[#allocation2 + $0x280] sm:$0xf]  ;;  %v1352_v16 = vor.u32 %v1633_v2, %v1351_v1 }
  0x33   :  { %749 = vmatpush.bf16.msrb.mxu3 %v1140_v10  ;;  %v1646_v10 = vld [vmem:[#allocation2 + $0x274] sm:$0xf]  ;;  %v1409_v11 = vld [vmem:[#allocation2 + $0x278] sm:$0xf0]  ;;  %v1649_v14 = vld [vmem:[#allocation2 + $0x284] sm:$0xf0] }
  0x34   :  { %723 = vmatpush.bf16.msrb.mxu1 %v1456_v17  ;;  %v48_v15 = vld [vmem:[%s1918_s0 + $0x20] sm:$0xff]  ;;  %v1100_v17 = vor.u32 %v1568_v5, %v1097_v6  ;;  %v1161_v19 = vld [vmem:[#allocation2 + $0x88] sm:$0xf0]  ;;  %v1630_v20 = vld [vmem:[#allocation2 + $0x1f4] sm:$0xf]  ;;  %v1416_v26 = vor.u32 %v1649_v14, %v1415_v13 }
  0x35   :  { %711 = vmatpush.bf16.msrb.mxu0 %v1384_v21  ;;  %v1284_v21 = vor.u32 %v1614_v7, %v1281_v9  ;;  %v1345_v23 = vld [vmem:[#allocation2 + $0x1f8] sm:$0xf0]  ;;  %v1662_v24 = vld [vmem:[#allocation2 + $0x2f4] sm:$0xf]  ;;  %v49_v27 = vld [vmem:[%s1918_s0 + $0x28] sm:$0xff] }
  0x36   :  { %762 = vmatpush.bf16.msra.mxu2 %v1204_v18  ;;  %v1584_v18 = vld [vmem:[#allocation2 + $0x84] sm:$0xf]  ;;  %v1473_v25 = vld [vmem:[#allocation2 + $0x2f8] sm:$0xf0]  ;;  %v1401_v33 = vld [vmem:[#allocation2 + $0x268] sm:$0xf0]  ;;  %v1834_v37 = vpack.c.bf16 %v49_v27, %v49_v27 }
  0x37   :  { %750 = vmatpush.bf16.msrb.mxu3 %v1132_v22  ;;  %v1412_v22 = vor.u32 %v1646_v10, %v1409_v11  ;;  %v1612_v28 = vld [vmem:[#allocation2 + $0x164] sm:$0xf]  ;;  %v1164_v31 = vor.u32 %v1584_v18, %v1161_v19  ;;  %v1337_v39 = vld [vmem:[#allocation2 + $0x1e8] sm:$0xf0]  ;;  %v1265_v45 = vld [vmem:[#allocation2 + $0x158] sm:$0xf0] }
  0x38   :  { %724 = vmatpush.bf16.msrb.mxu1 %v1448_v29  ;;  %v1273_v29 = vld [vmem:[#allocation2 + $0x168] sm:$0xf0]  ;;  %v1644_v32 = vld [vmem:[#allocation2 + $0x264] sm:$0xf]  ;;  %v1642_v46 = vld [vmem:[#allocation2 + $0x254] sm:$0xf] }
  0x39   :  { %712 = vmatpush.bf16.msrb.mxu0 %v1376_v34  ;;  %1485 = vmatmul.msk.bf16.vlgmr.msrb.gmra.mxu2 %vm652_vm0, %v1822_v43  ;;  %v1348_v34 = vor.u32 %v1630_v20, %v1345_v23  ;;  %v1628_v36 = vld [vmem:[#allocation2 + $0x1e4] sm:$0xf]  ;;  %v1276_v38 = vor.u32 %v1612_v28, %v1273_v29  ;;  %v1465_v41 = vld [vmem:[#allocation2 + $0x2e8] sm:$0xf0]  ;;  %v1626_v50 = vld [vmem:[#allocation2 + $0x1d4] sm:$0xf] }
  0x3a   :  { %763 = vmatpush.bf16.msra.mxu2 %v1196_v30  ;;  %v1832_v30 = vpack.c.bf16 %v48_v15, %v48_v15  ;;  %v1660_v40 = vld [vmem:[#allocation2 + $0x2e4] sm:$0xf]  ;;  %v1329_v53 = vld [vmem:[#allocation2 + $0x1d8] sm:$0xf0]  ;;  %v1658_v54 = vld [vmem:[#allocation2 + $0x2d4] sm:$0xf] }
  0x3b   :  { %751 = vmatpush.bf16.msrb.mxu3 %v1124_v35  ;;  %v1476_v35 = vor.u32 %v1662_v24, %v1473_v25  ;;  %v1468_v49 = vor.u32 %v1660_v40, %v1465_v41  ;;  %v1457_v55 = vld [vmem:[#allocation2 + $0x2d8] sm:$0xf0]  ;;  %v1257_v59 = vld [vmem:[#allocation2 + $0x148] sm:$0xf0]  ;;  %v1640_v60 = vld [vmem:[#allocation2 + $0x244] sm:$0xf] }
  0x3c   :  { %725 = vmatpush.bf16.msrb.mxu1 %v1440_v42  ;;  %v1404_v42 = vor.u32 %v1644_v32, %v1401_v33  ;;  %v1385_v61 = vld [vmem:[#allocation2 + $0x248] sm:$0xf0]  ;;  %v1624_v0 = vld [vmem:[#allocation2 + $0x1c4] sm:$0xf]  ;;  %v1249_v9 = vld [vmem:[#allocation2 + $0x138] sm:$0xf0] }
  0x3d   :  { %713 = vmatpush.bf16.msrb.mxu0 %v1368_v47  ;;  %v1393_v47 = vld [vmem:[#allocation2 + $0x258] sm:$0xf0]  ;;  %v1321_v2 = vld [vmem:[#allocation2 + $0x1c8] sm:$0xf0]  ;;  %v1656_v5 = vld [vmem:[#allocation2 + $0x2c4] sm:$0xf]  ;;  %v1388_v7 = vor.u32 %v1640_v60, %v1385_v61 }
  0x3e   :  { %764 = vmatpush.bf16.msra.mxu2 %v1188_v44  ;;  %v1610_v44 = vld [vmem:[#allocation2 + $0x154] sm:$0xf]  ;;  %v1449_v6 = vld [vmem:[#allocation2 + $0x2c8] sm:$0xf0]  ;;  %v1324_v11 = vor.u32 %v1624_v0, %v1321_v2  ;;  %v1313_v14 = vld [vmem:[#allocation2 + $0x1b8] sm:$0xf0] }
  0x3f   :  { %752 = vmatpush.bf16.msrb.mxu3 %v1116_v48  ;;  %v1340_v48 = vor.u32 %v1628_v36, %v1337_v39  ;;  %v1268_v52 = vor.u32 %v1610_v44, %v1265_v45  ;;  %v1638_v10 = vld [vmem:[#allocation2 + $0x234] sm:$0xf]  ;;  %v1604_v18 = vld [vmem:[#allocation2 + $0x124] sm:$0xf]  ;;  %v1241_v19 = vld [vmem:[#allocation2 + $0x128] sm:$0xf0] }
  0x40   :  { %726 = vmatpush.bf16.msrb.mxu1 %v1432_v56  ;;  %v1396_v56 = vor.u32 %v1642_v46, %v1393_v47  ;;  %v1654_v15 = vld [vmem:[#allocation2 + $0x2b4] sm:$0xf]  ;;  %v1636_v20 = vld [vmem:[#allocation2 + $0x224] sm:$0xf]  ;;  %v1244_v25 = vor.u32 %v1604_v18, %v1241_v19  ;;  %v1433_v28 = vld [vmem:[#allocation2 + $0x2a8] sm:$0xf0] }
  0x41   :  { %714 = vmatpush.bf16.msrb.mxu0 %v1360_v62  ;;  %v1332_v62 = vor.u32 %v1626_v50, %v1329_v53  ;;  %v1620_v24 = vld [vmem:[#allocation2 + $0x1a4] sm:$0xf]  ;;  %v1233_v32 = vld [vmem:[#allocation2 + $0x118] sm:$0xf0]  ;;  %v1634_v33 = vld [vmem:[#allocation2 + $0x214] sm:$0xf] }
  0x42   :  { %765 = vmatpush.bf16.msra.mxu2 %v1180_v57  ;;  %v1608_v57 = vld [vmem:[#allocation2 + $0x144] sm:$0xf]  ;;  %v1297_v40 = vld [vmem:[#allocation2 + $0x198] sm:$0xf0]  ;;  %v1650_v41 = vld [vmem:[#allocation2 + $0x294] sm:$0xf] }
  0x43   :  { %753 = vmatpush.bf16.msrb.mxu3 %v1108_v63  ;;  %v1460_v63 = vor.u32 %v1658_v54, %v1457_v55  ;;  %v1260_v1 = vor.u32 %v1608_v57, %v1257_v59  ;;  %v1652_v27 = vld [vmem:[#allocation2 + $0x2a4] sm:$0xf]  ;;  %v1225_v46 = vld [vmem:[#allocation2 + $0x108] sm:$0xf0]  ;;  %v1673_v0 = vld [vmem:[%s1921_s3 + $0x38] sm:$0xff] }
  0x44   :  { %727 = vmatpush.bf16.msrb.mxu1 %v1424_v8  ;;  %v1606_v8 = vld [vmem:[#allocation2 + $0x134] sm:$0xf]  ;;  %v1436_v36 = vor.u32 %v1652_v27, %v1433_v28  ;;  %v1600_v45 = vld [vmem:[#allocation2 + $0x104] sm:$0xf]  ;;  %v1481_v50 = vld [vmem:[#allocation2 + $0x308] sm:$0xf0] }
  0x45   :  { %715 = vmatpush.bf16.msrb.mxu0 %v1352_v16  ;;  %v1252_v13 = vor.u32 %v1606_v8, %v1249_v9  ;;  %v1441_v16 = vld [vmem:[#allocation2 + $0x2b8] sm:$0xf0]  ;;  %v1632_v47 = vld [vmem:[#allocation2 + $0x204] sm:$0xf]  ;;  %v1228_v54 = vor.u32 %v1600_v45, %v1225_v46  ;;  %v1417_v60 = vld [vmem:[#allocation2 + $0x288] sm:$0xf0] }
  0x46   :  { %766 = vmatpush.bf16.msra.mxu2 %v1172_v12  ;;  %v1622_v12 = vld [vmem:[#allocation2 + $0x1b4] sm:$0xf]  ;;  %v1444_v23 = vor.u32 %v1654_v15, %v1441_v16  ;;  %v1616_v55 = vld [vmem:[#allocation2 + $0x184] sm:$0xf]  ;;  %v156_v8 = vld [vmem:[%s1920_s2] sm:$0x3] }
  0x47   :  { %754 = vmatpush.bf16.msrb.mxu3 %v1100_v17  ;;  %v1648_v59 = vld [vmem:[#allocation2 + $0x284] sm:$0xf]  ;;  %v1679_v15 = vld [vmem:[%s1921_s3 + $0x68] sm:$0xff] }
  0x48   :  { %728 = vmatpush.bf16.msrb.mxu1 %v1416_v26  ;;  %716 = vmatmul.bf16.vlgmr.msrb.gmra.mxu0 %v1832_v30  ;;  %v1305_v26 = vld [vmem:[#allocation2 + $0x1a8] sm:$0xf0] }
  0x49   :  { %773 = vmatpush.bf16.msra.mxu0 %v1284_v21  ;;  %v1369_v21 = vld [vmem:[#allocation2 + $0x228] sm:$0xf0] }
  0x4a   :  { %767 = vmatpush.bf16.msra.mxu2 %v1164_v31  ;;  %755 = vmatmul.bf16.vlgmr.msrb.gmra.mxu3 %v1809_v58  ;;  %v1452_v58 = vor.u32 %v1656_v5, %v1449_v6  ;;  %v1372_v29 = vor.u32 %v1636_v20, %v1369_v21  ;;  %v1602_v31 = vld [vmem:[#allocation2 + $0x114] sm:$0xf]  ;;  %v1666_v5 = vld [vmem:[%s1921_s3] sm:$0xff] }
  0x4b   :  { %799 = vmatpush.bf16.msra.mxu3 %v1412_v22  ;;  %729 = vmatmul.bf16.vlgmr.msrb.gmra.mxu1 %v1834_v37  ;;  %v1316_v22 = vor.u32 %v1622_v12, %v1313_v14  ;;  %v1236_v39 = vor.u32 %v1602_v31, %v1233_v32  ;;  %v1680_v12 = vld [vmem:[%s1921_s3 + $0x70] sm:$0xff]  ;;  %v1678_v20 = vld [vmem:[%s1921_s3 + $0x60] sm:$0xff] }
  0x4c   :  { %786 = vmatpush.bf16.msra.mxu1 %v1348_v34  ;;  %v1361_v34 = vld [vmem:[#allocation2 + $0x218] sm:$0xf0] }
  0x4d   :  { %774 = vmatpush.bf16.msra.mxu0 %v1276_v38  ;;  %768 = vmatmul.bf16.vlgmr.msra.gmra.mxu2 %v1813_v4  ;;  %v1377_v4 = vld [vmem:[#allocation2 + $0x238] sm:$0xf0]  ;;  %v1618_v38 = vld [vmem:[#allocation2 + $0x194] sm:$0xf]  ;;  %v1364_v44 = vor.u32 %v1634_v33, %v1361_v34 }
  0x4e   :  { %812 = vmatpush.bf16.msrb.mxu2 %v1476_v35  ;;  %v1380_v17 = vor.u32 %v1638_v10, %v1377_v4  ;;  %v1308_v35 = vor.u32 %v1620_v24, %v1305_v26  ;;  %v1681_v4 = vld [vmem:[%s1921_s3 + $0x78] sm:$0xff] }
  0x4f   :  { %800 = vmatpush.bf16.msra.mxu3 %v1404_v42  ;;  %v1425_v42 = vld [vmem:[#allocation2 + $0x298] sm:$0xf0] }
  0x50   :  { %787 = vmatpush.bf16.msra.mxu1 %v1340_v48  ;;  %v1353_v48 = vld [vmem:[#allocation2 + $0x208] sm:$0xf0]  ;;  %v1428_v53 = vor.u32 %v1650_v41, %v1425_v42  ;;  %v1677_v26 = vld [vmem:[%s1921_s3 + $0x58] sm:$0xff]  ;;  %v159_v41 = vperm.slane %v156_v8, 1 }
  0x51   :  { %775 = vmatpush.bf16.msra.mxu0 %v1268_v52  ;;  %v1300_v52 = vor.u32 %v1618_v38, %v1297_v40  ;;  %v1356_v57 = vor.u32 %v1632_v47, %v1353_v48  ;;  %v1674_v38 = vld [vmem:[%s1921_s3 + $0x40] sm:$0xff] }
  0x52   :  { %813 = vmatpush.bf16.msrb.mxu2 %v1468_v49  ;;  %v1664_v49 = vld [vmem:[#allocation2 + $0x304] sm:$0xf] }
  0x53   :  { %801 = vmatpush.bf16.msra.mxu3 %v1396_v56  ;;  %v1289_v56 = vld [vmem:[#allocation2 + $0x188] sm:$0xf0]  ;;  %v1484_v61 = vor.u32 %v1664_v49, %v1481_v50 }
  0x54   :  { %788 = vmatpush.bf16.msra.mxu1 %v1332_v62  ;;  %v1292_v62 = vor.u32 %v1616_v55, %v1289_v56 }
  0x55   :  { %776 = vmatpush.bf16.msra.mxu0 %v1260_v1  ;;  %v1672_v1 = vld [vmem:[%s1921_s3 + $0x30] sm:$0xff] }
  0x56   :  { %814 = vmatpush.bf16.msrb.mxu2 %v1460_v63  ;;  %v1420_v63 = vor.u32 %v1648_v59, %v1417_v60 }
  0x57   :  { %802 = vmatpush.bf16.msra.mxu3 %v1388_v7 }
  0x58   :  { %789 = vmatpush.bf16.msra.mxu1 %v1324_v11 }
  0x59   :  { %777 = vmatpush.bf16.msra.mxu0 %v1252_v13 }
  0x5a   :  { %815 = vmatpush.bf16.msrb.mxu2 %v1452_v58  ;;  %v158_v58 = vperm.slane %v156_v8, 0  ;;  %v1691_v8 = vld [vmem:[%s1924_s6] ss:$0 sm:$0xff] }
  0x5b   :  { %803 = vmatpush.bf16.msra.mxu3 %v1380_v17 }
  0x5c   :  { %790 = vmatpush.bf16.msra.mxu1 %v1316_v22 }
  0x5d   :  { %778 = vmatpush.bf16.msra.mxu0 %v1244_v25 }
  0x5e   :  { %816 = vmatpush.bf16.msrb.mxu2 %v1444_v23 }
  0x5f   :  { %804 = vmatpush.bf16.msra.mxu3 %v1372_v29  ;;  %v1676_v29 = vld [vmem:[%s1921_s3 + $0x50] sm:$0xff] }
  0x60   :  { %791 = vmatpush.bf16.msra.mxu1 %v1308_v35 }
  0x61   :  { %779 = vmatpush.bf16.msra.mxu0 %v1236_v39 }
  0x62   :  { %817 = vmatpush.bf16.msrb.mxu2 %v1436_v36  ;;  %v1675_v36 = vld [vmem:[%s1921_s3 + $0x48] sm:$0xff] }
  0x63   :  { %805 = vmatpush.bf16.msra.mxu3 %v1364_v44 }
  0x64   :  { %792 = vmatpush.bf16.msra.mxu1 %v1300_v52 }
  0x65   :  { %780 = vmatpush.bf16.msra.mxu0 %v1228_v54 }
  0x66   :  { %818 = vmatpush.bf16.msrb.mxu2 %v1428_v53 }
  0x67   :  { %806 = vmatpush.bf16.msra.mxu3 %v1356_v57 }
  0x68   :  { %793 = vmatpush.bf16.msra.mxu1 %v1292_v62  ;;  %781 = vmatmul.bf16.vlgmr.msra.gmra.mxu0 %v1801_v51  ;;  %v1671_v51 = vld [vmem:[%s1921_s3 + $0x28] sm:$0xff] }
  0x69   :  { %832 = vmatpush.bf16.msrb.mxu0 %v1484_v61 }
  0x6a   :  { %807 = vmatmul.bf16.vlgmr.msra.gmra.mxu3 %v1832_v30  ;;  %819 = vmatpush.bf16.msrb.mxu2 %v1420_v63  ;;  %v1668_v30 = vld [vmem:[%s1921_s3 + $0x10] sm:$0xff]  ;;  %v1685_v63 = vld [vmem:[%s1923_s5 + $0x18] sm:$0xff] }
  0x6b   :  { %794 = vmatmul.bf16.vlgmr.msra.gmra.mxu1 %v1811_v3  ;;  %v1670_v3 = vld [vmem:[%s1921_s3 + $0x20] sm:$0xff]  ;;  %985 = vmatpush.bf16.msrb.mxu3 %v1681_v4 }
  0x6c   :  { %972 = vmatpush.bf16.msrb.mxu1 %v1673_v0  ;;  %v1684_v0 = vld [vmem:[%s1923_s5 + $0x10] sm:$0xff] }
  0x6d   :  { %820 = vmatmul.bf16.vlgmr.msrb.gmra.mxu2 %v1834_v37  ;;  %v1667_v37 = vld [vmem:[%s1921_s3 + $0x8] sm:$0xff]  ;;  %1043 = vmatpush.bf16.msra.mxu0 %v1685_v63 }
  0x6f   :  { %986 = vmatpush.bf16.msrb.mxu3 %v1680_v12 }
  0x70   :  { %973 = vmatpush.bf16.msrb.mxu1 %v1672_v1  ;;  %v1683_v1 = vld [vmem:[%s1923_s5 + $0x8] sm:$0xff] }
  0x71   :  { %1044 = vmatpush.bf16.msra.mxu0 %v1684_v0 }
  0x73   :  { %987 = vmatpush.bf16.msrb.mxu3 %v1679_v15 }
  0x74   :  { %974 = vmatpush.bf16.msrb.mxu1 %v1671_v51 }
  0x75   :  { %1045 = vmatpush.bf16.msra.mxu0 %v1683_v1 }
  0x77   :  { %988 = vmatpush.bf16.msrb.mxu3 %v1678_v20 }
  0x78   :  { %1486 = vmatmul.msk.bf16.vlgmr.msrb.gmra.mxu0 %vm652_vm0, %v1822_v43  ;;  %975 = vmatpush.bf16.msrb.mxu1 %v1670_v3  ;;  %v1669_v43 = vld [vmem:[%s1921_s3 + $0x18] sm:$0xff] }
  0x7b   :  { %989 = vmatpush.bf16.msrb.mxu3 %v1677_v26 }
  0x7c   :  { %976 = vmatpush.bf16.msrb.mxu1 %v1669_v43  ;;  %v1682_v43 = vld [vmem:[%s1923_s5] sm:$0xff] }
  0x7d   :  { %1046 = vmatpush.bf16.msra.mxu0 %v1682_v43 }
  0x7f   :  { %990 = vmatpush.bf16.msrb.mxu3 %v1676_v29 }
  0x80   :  { %977 = vmatpush.bf16.msrb.mxu1 %v1668_v30  ;;  %v1690_v30 = vld [vmem:[%s1922_s4] ss:$0 sm:$0xff]  ;;  %s1751_s4 = smov [#allocation5]  }
  0x81   :  { %s1081_s5 = sshll.u32 %s1751_s4, 4  ;;  %s1082_s5 = int_to_ptr.vmem [resolvable:$true] %s1081_s5 }
  0x83   :  { %991 = vmatpush.bf16.msrb.mxu3 %v1675_v36 }
  0x84   :  { %978 = vmatpush.bf16.msrb.mxu1 %v1667_v37 }
  0x87   :  { %992 = vmatpush.bf16.msrb.mxu3 %v1674_v38 }
  0x88   :  { %979 = vmatpush.bf16.msrb.mxu1 %v1666_v5 }
  0xa5   :  { %v665_v2 = vpop.f32.mrf.mxu0 }
  0xa6   :  { %v666_v14 = vadd.f32 %v665_v2, %v158_v58 }
  0xa8   :  { %v678_v6 = vpop.f32.mrf.mxu1 }
  0xa9   :  { %v679_v17 = vadd.f32 %v678_v6, %v666_v14 }
  0xac   :  { %v691_v7 = vpop.f32.mrf.mxu2 }
  0xad   :  { %v704_v9 = vpop.f32.mrf.mxu3  ;;  %v667_v10 = vpop.f32.mrf.mxu0  ;;  %v692_v19 = vadd.f32 %v691_v7, %v679_v17 }
  0xaf   :  { %v705_v21 = vadd.f32 %v704_v9, %v692_v19 }
  0xb0   :  { %v680_v11 = vpop.f32.mrf.mxu1 }
  0xb4   :  { %v693_v13 = vpop.f32.mrf.mxu2 }
  0xb5   :  { %v706_v16 = vpop.f32.mrf.mxu3 }
  0xbc   :  { %v743_v18 = vpop.f32.mrf.mxu2 }
  0xc4   :  { %v745_v24 = vpop.f32.mrf.mxu2 }
  0xc5   :  { %v717_v22 = vpop.f32.mrf.mxu0 }
  0xc6   :  { %v718_v23 = vadd.f32 %v717_v22, %v705_v21 }
  0xc8   :  { %v730_v25 = vpop.f32.mrf.mxu1 }
  0xc9   :  { %v731_v27 = vadd.f32 %v730_v25, %v718_v23 }
  0xcb   :  { %v744_v28 = vadd.f32 %v743_v18, %v731_v27 }
  0xcd   :  { %v838_v31 = vpack.c.bf16 %v744_v28, %v744_v28  ;;  %v719_v32 = vpop.f32.mrf.mxu0  ;;  %v756_v34 = vpop.f32.mrf.mxu3 }
  0xce   :  { %v757_v42 = vadd.f32 %v756_v34, %v159_v41 }
  0xcf   :  { %980 = vmatmul.bf16.vlgmr.msrb.gmra.mxu1 %v838_v31 }
  0xd0   :  { %v769_v33 = vpop.f32.mrf.mxu2  ;;  %v732_v35 = vpop.f32.mrf.mxu1 }
  0xd1   :  { %v770_v45 = vadd.f32 %v769_v33, %v757_v42 }
  0xd5   :  { %v758_v40 = vpop.f32.mrf.mxu3 }
  0xd8   :  { %v771_v39 = vpop.f32.mrf.mxu2 }
  0xe5   :  { %v782_v44 = vpop.f32.mrf.mxu0 }
  0xe6   :  { %v783_v47 = vadd.f32 %v782_v44, %v770_v45 }
  0xe8   :  { %v795_v46 = vpop.f32.mrf.mxu1 }
  0xe9   :  { %v796_v50 = vadd.f32 %v795_v46, %v783_v47 }
  0xed   :  { %v808_v48 = vpop.f32.mrf.mxu3  ;;  %v784_v49 = vpop.f32.mrf.mxu0 }
  0xee   :  { %v809_v53 = vadd.f32 %v808_v48, %v796_v50 }
  0xf0   :  { %v821_v52 = vpop.f32.mrf.mxu2  ;;  %v797_v54 = vpop.f32.mrf.mxu1 }
  0xf1   :  { %v822_v55 = vadd.f32 %v821_v52, %v809_v53 }
  0xf5   :  { %v810_v56 = vpop.f32.mrf.mxu3  ;;  %v834_v57 = vpop.f32.mrf.mxu0 }
  0xf6   :  { %v835_v59 = vadd.f32 %v834_v57, %v822_v55 }
  0xf8   :  { %v823_v60 = vpop.f32.mrf.mxu2  ;;  %v839_v61 = vpack.c.bf16 %v835_v59, %v835_v59 }
  0xfa   :  { %993 = vmatmul.bf16.vlgmr.msrb.gmra.mxu3 %v839_v61 }
  0xfd   :  { %v836_v62 = vpop.f32.mrf.mxu0 }
 0x14c   :  { %v981_v51 = vpop.f32.mrf.mxu1 }
 0x14d   :  { %v982_v37 = vadd.f32 %v1690_v30, %v981_v51 }
 0x154   :  { %v983_v3 = vpop.f32.mrf.mxu1 }
 0x17d   :  { %v994_v2 = vpop.f32.mrf.mxu3 }
 0x17e   :  { %v995_v5 = vadd.f32 %v994_v2, %v982_v37 }
 0x180   :  { %v998_v6 = vpack.c.bf16 %v995_v5, %v995_v5 }
 0x182   :  { %1567 = vmatmul.msk.bf16.vlgmr.msra.gmra.mxu0 %vm1035_vm1, %v998_v6 }
 0x185   :  { %v996_v7 = vpop.f32.mrf.mxu3 }
 0x1ff   :  { %v1048_v9 = vpop.f32.mrf.mxu0 }
 0x200   :  { %v1049_v10 = vadd.f32 %v1691_v8, %v1048_v9 }
 0x202   :  { %1052 = vmax.xlane.f32.xlu0 %v1049_v10 }
 0x207   :  { %v1050_v4 = vpop.f32.mrf.mxu0 }
 0x275   :  { %v1053_v11 = vpop.xlane.xlu0 %1052 }
 0x276   :  { %v1054_v58 = vsub.f32 %v1049_v10, %v1053_v11 }
 0x278   :  { %v1055_v12 = vmul.f32 1.442695, %v1054_v58 }
 0x27a   :  { %1692 = vpow2.f32 %v1055_v12 }
 0x280   :  { %v1693_v13 = vpop.eup %1692 }
 0x281   :  { %1057 = vadd.xlane.f32.xlu0 %v1693_v13 }
 0x2f4   :  { %v1058_v14 = vpop.xlane.xlu0 %1057 }
 0x2f5   :  { %1694 = vrcp.f32 %v1058_v14  ;;  %v1070_v18 = vand.u32 2147483648, %v1058_v14  ;;  %v1068_v20 = vand.u32 2147483647, %v1058_v14  ;;  %vm1064_vm3 = vweird.f32 %v1058_v14 }
 0x2f7   :  { %v1071_v22 = vor.u32 1.1754944e-38, %v1070_v18  ;;  %vm1069_vm5 = vcmp.eq.f32.partialorder %v1068_v20, 8.507059e+37 }
 0x2fb   :  { %v1695_v15 = vpop.eup %1694 }
 0x2fc   :  { %v1060_v16 = vmul.f32 %v1695_v15, %v1058_v14  ;;  %vm1065_vm2 = vweird.f32 %v1695_v15 }
 0x2fd   :  { %vm1066_vm4 = vmor %vm1064_vm3, %vm1065_vm2 }
 0x2fe   :  { %v1061_v17 = vsub.f32 1.0, %v1060_v16 }
 0x300   :  { %v1062_v19 = vmul.f32 %v1695_v15, %v1061_v17 }
 0x302   :  { %v1063_v21 = vadd.f32 %v1695_v15, %v1062_v19 }
 0x304   :  { %v1067_v23 = vsel %vm1066_vm4, %v1695_v15, %v1063_v21 }
 0x305   :  { %v1072_v24 = vsel %vm1069_vm5, %v1071_v22, %v1067_v23 }
 0x306   :  { %v1073_v25 = vmul.f32 %v1693_v13, %v1072_v24 }
 0x308   :  { %1075 = vst.msk [vmem:[#allocation5] sm:$0xff] %vm1074_vm6, %v1073_v25 }
 0x309   :  { %1086 = dma.vmem_to_hbm [thread:$0]  %s1082_s5, 128, %s1084_s16, [#allocation4]  }
 0x30a   :  { %1746 = dma.done.wait [#allocation4], 128  }
 0x30b   :  { %1747 = vsyncadd [#allocation4], 4294967168 }
 0x30c   :  { %1091 = vsyncpa [#allocation3], 1 }
 0x30d   :  { %1092 = vsyncpa [#allocation4], 1 }

</bundles_post_ra>
